<compile_context>
chip_gen: v6e
topology: v6e:2x2x1
jax: 0.10.0
libtpu: 0.0.40
codegen_flags: <defaults>
</compile_context>

<pallas_src>
import numpy as np
import jax
import jax.numpy as jnp
from jax.experimental import pallas as pl
from jax.experimental.pallas import tpu as pltpu

# ---------------- config (small, deterministic) ----------------
N = 2            # batch
C_IN = 16        # pretrained visual feature channels (stand-in for 1024/2048)
H = W = 8
O = H * W
M = N * O        # 128 -- flattened batch*object slab
CV_FILTER = 24   # args.cv_filter
TE_HIDDEN = 6    # args.te_hidden
AUX_D = 2 + TE_HIDDEN              # 2 coords + question code
D_IN = CV_FILTER + AUX_D           # 32
GT_HIDDEN = 64   # args.basern_gt_hidden
FP_HIDDEN = 64   # args.basern_fp_hidden
A_SIZE = 10      # args.a_size
Q_SIZE = 20      # vocab size
TE_EMB = 16      # args.te_embedding
Q_LEN = 8        # question length
K_CONV = 9 * C_IN                  # 144 (im2col contraction dim)
K_FUSED = K_CONV + AUX_D           # 152 (folded layer-1 contraction dim, %8==0)
LANE = 128                         # pad every matmul output dim to lane width


# ---------------- fused kernel: folded conv+g_theta layer1, g2, g3, sum, f_phi ----------------
def basern_fused_kernel(slab_ref, sum_ref, w1_ref, wsq_ref, bias_ref, out_ref):
    f32 = jnp.float32
    b = bias_ref[...]                                        # (5, 128)

    # layer 1 (conv folded in):  [patches | coords | code] @ W1' + b1'
    h = jnp.maximum(
        jnp.dot(slab_ref[...], w1_ref[...], preferred_element_type=f32) + b[0:1], 0.0)
    # g_theta layers 2, 3  (padded lanes >=64 stay exactly zero: zero weight
    # cols, zero bias cols, ReLU(0)=0 -> they never pollute later matmuls)
    h = jnp.maximum(jnp.dot(h, wsq_ref[0], preferred_element_type=f32) + b[1:2], 0.0)
    h = jnp.maximum(jnp.dot(h, wsq_ref[1], preferred_element_type=f32) + b[2:3], 0.0)

    # relations = g_theta(pairs).sum(objects): block-diagonal ones matmul on MXU
    rel = jnp.dot(sum_ref[...], h, preferred_element_type=f32)        # (N, 128)

    # f_phi: Linear+ReLU, (dropout == identity at inference), Linear -> logits
    z = jnp.maximum(jnp.dot(rel, wsq_ref[2], preferred_element_type=f32) + b[3:4], 0.0)
    out_ref[...] = jnp.dot(z, wsq_ref[3], preferred_element_type=f32) + b[4:5]


# ---------------- glue: text-encoder stub, im2col, aux columns ----------------
# TODO(synk): TextEncoder (embedding + GRU/LSTM) is not defined in the prompt;
# we use a deterministic embedding-mean + linear projection stand-in producing
# the question code of shape (N, TE_HIDDEN).
def text_encode_stub(question, question_length, emb, proj_w, proj_b):
    e = emb[question]                                              # (N, L, TE_EMB)
    mask = (jnp.arange(Q_LEN)[None, :] < question_length[:, None]).astype(jnp.float32)
    mean = (e * mask[..., None]).sum(1) / question_length[:, None].astype(jnp.float32)
    return jnp.tanh(mean @ proj_w + proj_b)                        # (N, TE_HIDDEN)


def _im2col(x_nhwc):
    n, h, w, cin = x_nhwc.shape
    xp = jnp.pad(x_nhwc, ((0, 0), (1, 1), (1, 1), (0, 0)))
    patches = [xp[:, di:di + h, dj:dj + w, :] for di in range(3) for dj in range(3)]
    return jnp.concatenate(patches, axis=-1).reshape(n * h * w, 9 * cin)


def _coords():
    xs = jnp.linspace(-1.0, 1.0, H)       # indexed by row  (PyTorch x_coordinate)
    ys = jnp.linspace(-1.0, 1.0, W)       # indexed by col  (PyTorch y_coordinate)
    xc = jnp.broadcast_to(xs[:, None], (H, W)).reshape(O, 1)
    yc = jnp.broadcast_to(ys[None, :], (H, W)).reshape(O, 1)
    return jnp.concatenate([xc, yc], axis=-1)                      # (O, 2)


# ---------------- parameters ----------------
def init_params(key):
    ks = jax.random.split(key, 9)

    def linear(k, fin, fout):
        bound = 1.0 / float(np.sqrt(fin))
        kw, kb = jax.random.split(k)
        w = jax.random.uniform(kw, (fin, fout), jnp.float32, -bound, bound)
        b = jax.random.uniform(kb, (1, fout), jnp.float32, -bound, bound)
        return w, b

    cbound = 1.0 / float(np.sqrt(9 * C_IN))
    conv_w = jax.random.uniform(ks[0], (CV_FILTER, C_IN, 3, 3), jnp.float32, -cbound, cbound)
    conv_b = jax.random.uniform(ks[1], (CV_FILTER,), jnp.float32, -cbound, cbound)
    emb = jax.random.normal(ks[2], (Q_SIZE, TE_EMB), jnp.float32) * 0.1
    proj_w, proj_b = linear(ks[3], TE_EMB, TE_HIDDEN)
    gw1, gb1 = linear(ks[4], D_IN, GT_HIDDEN)
    gw2, gb2 = linear(ks[5], GT_HIDDEN, GT_HIDDEN)
    gw3, gb3 = linear(ks[6], GT_HIDDEN, GT_HIDDEN)
    fw1, fb1 = linear(ks[7], GT_HIDDEN, FP_HIDDEN)
    fw2, fb2 = linear(ks[8], FP_HIDDEN, A_SIZE)
    return dict(conv_w=conv_w, conv_b=conv_b, emb=emb, proj_w=proj_w, proj_b=proj_b,
                g=(gw1, gb1, gw2, gb2, gw3, gb3), f=(fw1, fb1, fw2, fb2))


def pack_params(params):
    """One-time folding/padding/packing of all weights to 128-lane, few-array layout."""
    def pad_to(a, shape):
        z = jnp.zeros(shape, jnp.float32)
        return z.at[tuple(slice(0, s) for s in a.shape)].set(a)

    gw1, gb1, gw2, gb2, gw3, gb3 = params["g"]
    fw1, fb1, fw2, fb2 = params["f"]

    # conv weight as (9*C_IN, C_out) im2col matrix
    wm = jnp.transpose(params["conv_w"], (2, 3, 1, 0)).reshape(K_CONV, CV_FILTER)

    # Fold the (linear, no activation) conv into g_theta layer 1:
    #   rows 0..143  : Wconv @ Gw1[:CV_FILTER]      (patch columns)
    #   rows 144..151: Gw1[CV_FILTER:]              (coord + question-code columns)
    w1_fused = jnp.concatenate([wm @ gw1[:CV_FILTER], gw1[CV_FILTER:]], axis=0)
    w1_fused = pad_to(w1_fused, (K_FUSED, LANE))
    b1_fused = params["conv_b"].reshape(1, CV_FILTER) @ gw1[:CV_FILTER] + gb1   # (1, 64)

    # stacked square weights: [gw2, gw3, fw1, fw2], all padded to 128x128
    wsq = jnp.stack([
        pad_to(gw2, (LANE, LANE)),
        pad_to(gw3, (LANE, LANE)),
        pad_to(fw1, (LANE, LANE)),
        pad_to(fw2, (LANE, LANE)),
    ])

    biases = jnp.stack([
        pad_to(b1_fused, (1, LANE))[0],
        pad_to(gb2, (1, LANE))[0],
        pad_to(gb3, (1, LANE))[0],
        pad_to(fb1, (1, LANE))[0],
        pad_to(fb2, (1, LANE))[0],
    ])                                                  # (5, 128)

    # block-diagonal ones: rel[b] = sum_o h[b*O + o]
    sum_mat = jnp.repeat(jnp.eye(N, dtype=jnp.float32), O, axis=1)   # (N, N*O)
    return dict(w1=w1_fused, wsq=wsq, biases=biases, sum_mat=sum_mat)


# ---------------- forward (Pallas) ----------------
def basern_forward(image_nchw, question, question_length, params, packed):
    n = image_nchw.shape[0]
    x_nhwc = jnp.transpose(image_nchw, (0, 2, 3, 1))
    patches = _im2col(x_nhwc)                                       # (N*O, 144)
    code = text_encode_stub(question, question_length,
                            params["emb"], params["proj_w"], params["proj_b"])
    aux = jnp.concatenate([jnp.tile(_coords(), (n, 1)),
                           jnp.repeat(code, O, axis=0)], axis=-1)   # (N*O, 8)
    slab = jnp.concatenate([patches, aux], axis=-1)                 # (N*O, 152)

    logits_pad = pl.pallas_call(
        basern_fused_kernel,
        out_shape=jax.ShapeDtypeStruct((n, LANE), jnp.float32),
        grid=(1,),
        in_specs=[
            pl.BlockSpec((n * O, K_FUSED), lambda i: (0, 0)),
            pl.BlockSpec((n, n * O), lambda i: (0, 0)),
            pl.BlockSpec((K_FUSED, LANE), lambda i: (0, 0)),
            pl.BlockSpec((4, LANE, LANE), lambda i: (0, 0, 0)),
            pl.BlockSpec((5, LANE), lambda i: (0, 0)),
        ],
        out_specs=pl.BlockSpec((n, LANE), lambda i: (0, 0)),
        compiler_params=pltpu.CompilerParams(dimension_semantics=("arbitrary",)),
    )(slab, packed["sum_mat"], packed["w1"], packed["wsq"], packed["biases"])

    return logits_pad[:, :A_SIZE]


# ---------------- pure-JAX reference (unfolded, mirrors the PyTorch module) ----------------
def baseline_encode_jax(feat_nhwc, code):
    n, h, w, c = feat_nhwc.shape
    o = h * w
    coords = _coords()
    feat = feat_nhwc.reshape(n, o, c)
    hd = code.shape[1]
    return jnp.concatenate(
        [feat,
         jnp.broadcast_to(coords[None, :, 0:1], (n, o, 1)),
         jnp.broadcast_to(coords[None, :, 1:2], (n, o, 1)),
         jnp.broadcast_to(code[:, None, :], (n, o, hd))],
        axis=-1)


def basern_reference(image_nchw, question, question_length, params):
    out = jax.lax.conv_general_dilated(
        image_nchw, params["conv_w"], window_strides=(1, 1),
        padding=((1, 1), (1, 1)), dimension_numbers=("NCHW", "OIHW", "NCHW"))
    feat_nhwc = jnp.transpose(out + params["conv_b"][None, :, None, None], (0, 2, 3, 1))
    code = text_encode_stub(question, question_length,
                            params["emb"], params["proj_w"], params["proj_b"])
    pairs = baseline_encode_jax(feat_nhwc, code)
    gw1, gb1, gw2, gb2, gw3, gb3 = params["g"]
    fw1, fb1, fw2, fb2 = params["f"]
    h = jnp.maximum(pairs @ gw1 + gb1, 0.0)
    h = jnp.maximum(h @ gw2 + gb2, 0.0)
    h = jnp.maximum(h @ gw3 + gb3, 0.0)
    rel = h.sum(1)
    z = jnp.maximum(rel @ fw1 + fb1, 0.0)
    return z @ fw2 + fb2


if __name__ == "__main__":
    key = jax.random.PRNGKey(0)
    kimg, kq, kp = jax.random.split(key, 3)
    image = jax.random.normal(kimg, (N, C_IN, H, W), jnp.float32)
    question = jax.random.randint(kq, (N, Q_LEN), 0, Q_SIZE)
    question_length = jnp.array([Q_LEN, Q_LEN - 2], jnp.int32)
    params = init_params(kp)
    packed = pack_params(params)

    fwd = jax.jit(basern_forward)
    logits = fwd(image, question, question_length, params, packed)
    logits = jax.block_until_ready(logits)
    assert logits.shape == (N, A_SIZE)

    ref = basern_reference(image, question, question_length, params)
    np.testing.assert_allclose(np.asarray(logits), np.asarray(ref), rtol=1e-4, atol=1e-4)
    print("KERNEL_OK")
</pallas_src>

<mosaic_0001>
module attributes {stable_mosaic.version = 11 : i64} {
  func.func @basern_fused_kernel(%arg0: i32, %arg1: memref<128x152xf32, #tpu.memory_space<vmem>>, %arg2: memref<2x128xf32, #tpu.memory_space<vmem>>, %arg3: memref<152x128xf32, #tpu.memory_space<vmem>>, %arg4: memref<4x128x128xf32, #tpu.memory_space<vmem>>, %arg5: memref<5x128xf32, #tpu.memory_space<vmem>>, %arg6: memref<2x128xf32, #tpu.memory_space<vmem>>) attributes {dimension_semantics = [#tpu.dimension_semantics<arbitrary>], iteration_bounds = array<i64: 1>, scalar_prefetch = 0 : i64, scratch_operands = 0 : i64, tpu.core_type = #tpu.core_type<tc>, window_params = [{pipeline_mode = #tpu.pipeline_mode<synchronous>, transform_indices = @transform_0, window_bounds = array<i64: 128, 152>}, {pipeline_mode = #tpu.pipeline_mode<synchronous>, transform_indices = @transform_1, window_bounds = array<i64: 2, 128>}, {pipeline_mode = #tpu.pipeline_mode<synchronous>, transform_indices = @transform_2, window_bounds = array<i64: 152, 128>}, {pipeline_mode = #tpu.pipeline_mode<synchronous>, transform_indices = @transform_3, window_bounds = array<i64: 4, 128, 128>}, {pipeline_mode = #tpu.pipeline_mode<synchronous>, transform_indices = @transform_4, window_bounds = array<i64: 5, 128>}, {pipeline_mode = #tpu.pipeline_mode<synchronous>, transform_indices = @transform_5, window_bounds = array<i64: 2, 128>}]} {
    %c0 = arith.constant 0 : index
    %c0_0 = arith.constant 0 : index
    %0 = vector.load %arg5[%c0, %c0_0] : memref<5x128xf32, #tpu.memory_space<vmem>>, vector<5x128xf32>
    %c0_1 = arith.constant 0 : index
    %c0_2 = arith.constant 0 : index
    %1 = vector.load %arg1[%c0_1, %c0_2] : memref<128x152xf32, #tpu.memory_space<vmem>>, vector<128x152xf32>
    %c0_3 = arith.constant 0 : index
    %c0_4 = arith.constant 0 : index
    %2 = vector.load %arg3[%c0_3, %c0_4] : memref<152x128xf32, #tpu.memory_space<vmem>>, vector<152x128xf32>
    %cst = arith.constant dense<0.000000e+00> : vector<128x128xf32>
    %3 = tpu.matmul %1, %2, %cst {dimension_numbers = #tpu.dot_dimension_numbers<[1], [0], [0], [1], [0, 0, 1, 1], [], []>} : vector<128x152xf32>, vector<152x128xf32>, vector<128x128xf32> -> vector<128x128xf32>
    %4 = vector.extract_strided_slice %0 {offsets = [0, 0], sizes = [1, 128], strides = [1, 1]} : vector<5x128xf32> to vector<1x128xf32>
    %5 = vector.broadcast %4 : vector<1x128xf32> to vector<128x128xf32>
    %6 = arith.addf %3, %5 : vector<128x128xf32>
    %cst_5 = arith.constant 0.000000e+00 : f32
    %7 = vector.broadcast %cst_5 : f32 to vector<128x128xf32>
    %8 = arith.maximumf %6, %7 : vector<128x128xf32>
    %c0_6 = arith.constant 0 : index
    %c0_7 = arith.constant 0 : index
    %c0_8 = arith.constant 0 : index
    %9 = vector.load %arg4[%c0_6, %c0_7, %c0_8] : memref<4x128x128xf32, #tpu.memory_space<vmem>>, vector<1x128x128xf32>
    %10 = vector.shape_cast %9 : vector<1x128x128xf32> to vector<128x128xf32>
    %cst_9 = arith.constant dense<0.000000e+00> : vector<128x128xf32>
    %11 = tpu.matmul %8, %10, %cst_9 {dimension_numbers = #tpu.dot_dimension_numbers<[1], [0], [0], [1], [0, 0, 1, 1], [], []>} : vector<128x128xf32>, vector<128x128xf32>, vector<128x128xf32> -> vector<128x128xf32>
    %12 = vector.extract_strided_slice %0 {offsets = [1, 0], sizes = [1, 128], strides = [1, 1]} : vector<5x128xf32> to vector<1x128xf32>
    %13 = vector.broadcast %12 : vector<1x128xf32> to vector<128x128xf32>
    %14 = arith.addf %11, %13 : vector<128x128xf32>
    %cst_10 = arith.constant 0.000000e+00 : f32
    %15 = vector.broadcast %cst_10 : f32 to vector<128x128xf32>
    %16 = arith.maximumf %14, %15 : vector<128x128xf32>
    %c1 = arith.constant 1 : index
    %c0_11 = arith.constant 0 : index
    %c0_12 = arith.constant 0 : index
    %17 = vector.load %arg4[%c1, %c0_11, %c0_12] : memref<4x128x128xf32, #tpu.memory_space<vmem>>, vector<1x128x128xf32>
    %18 = vector.shape_cast %17 : vector<1x128x128xf32> to vector<128x128xf32>
    %cst_13 = arith.constant dense<0.000000e+00> : vector<128x128xf32>
    %19 = tpu.matmul %16, %18, %cst_13 {dimension_numbers = #tpu.dot_dimension_numbers<[1], [0], [0], [1], [0, 0, 1, 1], [], []>} : vector<128x128xf32>, vector<128x128xf32>, vector<128x128xf32> -> vector<128x128xf32>
    %20 = vector.extract_strided_slice %0 {offsets = [2, 0], sizes = [1, 128], strides = [1, 1]} : vector<5x128xf32> to vector<1x128xf32>
    %21 = vector.broadcast %20 : vector<1x128xf32> to vector<128x128xf32>
    %22 = arith.addf %19, %21 : vector<128x128xf32>
    %cst_14 = arith.constant 0.000000e+00 : f32
    %23 = vector.broadcast %cst_14 : f32 to vector<128x128xf32>
    %24 = arith.maximumf %22, %23 : vector<128x128xf32>
    %c0_15 = arith.constant 0 : index
    %c0_16 = arith.constant 0 : index
    %25 = vector.load %arg2[%c0_15, %c0_16] : memref<2x128xf32, #tpu.memory_space<vmem>>, vector<2x128xf32>
    %cst_17 = arith.constant dense<0.000000e+00> : vector<2x128xf32>
    %26 = tpu.matmul %25, %24, %cst_17 {dimension_numbers = #tpu.dot_dimension_numbers<[1], [0], [0], [1], [0, 0, 1, 1], [], []>} : vector<2x128xf32>, vector<128x128xf32>, vector<2x128xf32> -> vector<2x128xf32>
    %c2 = arith.constant 2 : index
    %c0_18 = arith.constant 0 : index
    %c0_19 = arith.constant 0 : index
    %27 = vector.load %arg4[%c2, %c0_18, %c0_19] : memref<4x128x128xf32, #tpu.memory_space<vmem>>, vector<1x128x128xf32>
    %28 = vector.shape_cast %27 : vector<1x128x128xf32> to vector<128x128xf32>
    %cst_20 = arith.constant dense<0.000000e+00> : vector<2x128xf32>
    %29 = tpu.matmul %26, %28, %cst_20 {dimension_numbers = #tpu.dot_dimension_numbers<[1], [0], [0], [1], [0, 0, 1, 1], [], []>} : vector<2x128xf32>, vector<128x128xf32>, vector<2x128xf32> -> vector<2x128xf32>
    %30 = vector.extract_strided_slice %0 {offsets = [3, 0], sizes = [1, 128], strides = [1, 1]} : vector<5x128xf32> to vector<1x128xf32>
    %31 = vector.broadcast %30 : vector<1x128xf32> to vector<2x128xf32>
    %32 = arith.addf %29, %31 : vector<2x128xf32>
    %cst_21 = arith.constant 0.000000e+00 : f32
    %33 = vector.broadcast %cst_21 : f32 to vector<2x128xf32>
    %34 = arith.maximumf %32, %33 : vector<2x128xf32>
    %c3 = arith.constant 3 : index
    %c0_22 = arith.constant 0 : index
    %c0_23 = arith.constant 0 : index
    %35 = vector.load %arg4[%c3, %c0_22, %c0_23] : memref<4x128x128xf32, #tpu.memory_space<vmem>>, vector<1x128x128xf32>
    %36 = vector.shape_cast %35 : vector<1x128x128xf32> to vector<128x128xf32>
    %cst_24 = arith.constant dense<0.000000e+00> : vector<2x128xf32>
    %37 = tpu.matmul %34, %36, %cst_24 {dimension_numbers = #tpu.dot_dimension_numbers<[1], [0], [0], [1], [0, 0, 1, 1], [], []>} : vector<2x128xf32>, vector<128x128xf32>, vector<2x128xf32> -> vector<2x128xf32>
    %38 = vector.extract_strided_slice %0 {offsets = [4, 0], sizes = [1, 128], strides = [1, 1]} : vector<5x128xf32> to vector<1x128xf32>
    %39 = vector.broadcast %38 : vector<1x128xf32> to vector<2x128xf32>
    %40 = arith.addf %37, %39 : vector<2x128xf32>
    %c0_25 = arith.constant 0 : index
    %c0_26 = arith.constant 0 : index
    %41 = vector.load %arg6[%c0_25, %c0_26] : memref<2x128xf32, #tpu.memory_space<vmem>>, vector<2x128xf32>
    tpu.vector_store %arg6[%c0_25, %c0_26], %40 {strides = array<i32>} : memref<2x128xf32, #tpu.memory_space<vmem>>, vector<2x128xf32>,
    return
  }
  func.func @transform_0(%arg0: i32) -> (i32, i32) {
    %c0_i32 = arith.constant 0 : i32
    %c0_i32_0 = arith.constant 0 : i32
    %c0_i32_1 = arith.constant 0 : i32
    return %c0_i32, %c0_i32_0 : i32, i32
  }
  func.func @transform_1(%arg0: i32) -> (i32, i32) {
    %c0_i32 = arith.constant 0 : i32
    %c0_i32_0 = arith.constant 0 : i32
    %c0_i32_1 = arith.constant 0 : i32
    return %c0_i32, %c0_i32_0 : i32, i32
  }
  func.func @transform_2(%arg0: i32) -> (i32, i32) {
    %c0_i32 = arith.constant 0 : i32
    %c0_i32_0 = arith.constant 0 : i32
    %c0_i32_1 = arith.constant 0 : i32
    return %c0_i32, %c0_i32_0 : i32, i32
  }
  func.func @transform_3(%arg0: i32) -> (i32, i32, i32) {
    %c0_i32 = arith.constant 0 : i32
    %c0_i32_0 = arith.constant 0 : i32
    %c0_i32_1 = arith.constant 0 : i32
    %c0_i32_2 = arith.constant 0 : i32
    return %c0_i32, %c0_i32_0, %c0_i32_1 : i32, i32, i32
  }
  func.func @transform_4(%arg0: i32) -> (i32, i32) {
    %c0_i32 = arith.constant 0 : i32
    %c0_i32_0 = arith.constant 0 : i32
    %c0_i32_1 = arith.constant 0 : i32
    return %c0_i32, %c0_i32_0 : i32, i32
  }
  func.func @transform_5(%arg0: i32) -> (i32, i32) {
    %c0_i32 = arith.constant 0 : i32
    %c0_i32_0 = arith.constant 0 : i32
    %c0_i32_1 = arith.constant 0 : i32
    return %c0_i32, %c0_i32_0 : i32, i32
  }
}

</mosaic_0001>

<bundles_post_ra>
// kernel: basern_forward.1
= control target key start
LH: loop header
LB: loop body
LE: loop exit
PB: predicated region body
PF: predicated region fallthrough
CT: control target
= control target key end

     0   :  { %v1340_v1 = vmov 0.0   ;;  %vm77_vm0 = vcmask 195584   ;;  %s1854_s0 = inlined_call_operand.vmem [shape: f32[128,152], index: 0, kind: input, shape index: {}]   ;;  %s1855_s1 = inlined_call_operand.vmem [shape: f32[2,128], index: 1, kind: input, shape index: {}]   ;;  %s1856_s2 = inlined_call_operand.vmem [shape: f32[152,128], index: 2, kind: input, shape index: {}]   ;;  %s1857_s3 = inlined_call_operand.vmem [shape: f32[4,128,128], index: 3, kind: input, shape index: {}]   ;;  %s1858_s4 = inlined_call_operand.vmem [shape: f32[5,128], index: 4, kind: input, shape index: {}]   ;;  %s1859_s5 = inlined_call_operand.hbm [shape: f32[2,128], index: 5, kind: output, shape index: {}]  }
   0x1   :  { %v69_v0 = vld [vmem:[%s1856_s2 + $0x78] sm:$0xff]  ;;  %126 = vmatprep.subr.mxu0 %v1340_v1  ;;  %v68_v2 = vld [vmem:[%s1856_s2 + $0x70] sm:$0xff]  ;;  %v67_v3 = vld [vmem:[%s1856_s2 + $0x68] sm:$0xff] }
   0x2   :  { %127 = vmatpush1.msra.mxu0 %v69_v0  ;;  %v66_v4 = vld [vmem:[%s1856_s2 + $0x60] sm:$0xff]  ;;  %v23_v5 = vld [vmem:[%s1854_s0 + $0x8] sm:$0xff]  ;;  %v65_v6 = vld [vmem:[%s1856_s2 + $0x58] sm:$0xff] }
   0x3   :  { %128 = vmatprep.subr.mxu0 %v1340_v1  ;;  %919 = vmatprep.mubr.msk.f32.mxu0 %vm77_vm0, %v23_v5  ;;  %v64_v7 = vld [vmem:[%s1856_s2 + $0x50] sm:$0xff]  ;;  %v63_v8 = vld [vmem:[%s1856_s2 + $0x48] sm:$0xff]  ;;  %v62_v9 = vld [vmem:[%s1856_s2 + $0x40] sm:$0xff] }
   0x4   :  { %129 = vmatpush1.msra.mxu0 %v68_v2  ;;  %v61_v10 = vld [vmem:[%s1856_s2 + $0x38] sm:$0xff]  ;;  %v60_v11 = vld [vmem:[%s1856_s2 + $0x30] sm:$0xff]  ;;  %v59_v14 = vld [vmem:[%s1856_s2 + $0x28] sm:$0xff] }
   0x5   :  { %130 = vmatprep.subr.mxu0 %v1340_v1  ;;  %v302_v12 = vld [vmem:[%s1857_s3 + $0x78] sm:$0xff]  ;;  %v301_v13 = vld [vmem:[%s1857_s3 + $0x70] sm:$0xff]  ;;  %v300_v15 = vld [vmem:[%s1857_s3 + $0x68] sm:$0xff] }
   0x6   :  { %131 = vmatpush1.msra.mxu0 %v67_v3  ;;  %1098 = vmatprep.subr.mxu1 %v302_v12  ;;  %v58_v16 = vld [vmem:[%s1856_s2 + $0x20] sm:$0xff] }
   0x7   :  { %132 = vmatprep.subr.mxu0 %v1340_v1  ;;  %1099 = vmatpush3.msra.mxu1 %v302_v12  ;;  %v299_v17 = vld [vmem:[%s1857_s3 + $0x60] sm:$0xff] }
   0x8   :  { %133 = vmatpush1.msra.mxu0 %v66_v4  ;;  %1100 = vmatprep.subr.mxu1 %v301_v13 }
   0x9   :  { %134 = vmatprep.subr.mxu0 %v1340_v1  ;;  %1101 = vmatpush3.msra.mxu1 %v301_v13 }
   0xa   :  { %135 = vmatpush1.msra.mxu0 %v65_v6 }
   0xb   :  { %136 = vmatprep.subr.mxu0 %v1340_v1 }
   0xc   :  { %137 = vmatpush1.msra.mxu0 %v64_v7 }
   0xd   :  { %138 = vmatprep.subr.mxu0 %v1340_v1 }
   0xe   :  { %139 = vmatpush1.msra.mxu0 %v63_v8 }
   0xf   :  { %140 = vmatprep.subr.mxu0 %v1340_v1 }
  0x10   :  { %141 = vmatpush1.msra.mxu0 %v62_v9 }
  0x11   :  { %142 = vmatprep.subr.mxu0 %v1340_v1 }
  0x12   :  { %143 = vmatpush1.msra.mxu0 %v61_v10 }
  0x13   :  { %144 = vmatprep.subr.mxu0 %v1340_v1 }
  0x14   :  { %145 = vmatpush1.msra.mxu0 %v60_v11 }
  0x15   :  { %146 = vmatprep.subr.mxu0 %v1340_v1 }
  0x16   :  { %10 = vsyncpa [#allocation3], 0  ;;  %147 = vmatpush1.msra.mxu0 %v59_v14  ;;  %1102 = vmatprep.subr.mxu1 %v300_v15  ;;  %v57_v18 = vld [vmem:[%s1856_s2 + $0x18] sm:$0xff]  ;;  %v56_v20 = vld [vmem:[%s1856_s2 + $0x10] sm:$0xff]  ;;  %v73_v6 = vlaneseq  ;;  %vm1341_vm1 = vmmov 0   ;;  %s1342_s11 = smov [#allocation2]  }
  0x17   :  { %148 = vmatprep.subr.mxu0 %v1340_v1  ;;  %1103 = vmatpush3.msra.mxu1 %v300_v15  ;;  %v298_v19 = vld [vmem:[%s1857_s3 + $0x58] sm:$0xff]  ;;  %v297_v21 = vld [vmem:[%s1857_s3 + $0x50] sm:$0xff]  ;;  %v55_v22 = vld [vmem:[%s1856_s2 + $0x8] sm:$0xff] }
  0x18   :  { %149 = vmatpush1.msra.mxu0 %v58_v16  ;;  %1104 = vmatprep.subr.mxu1 %v299_v17  ;;  %v296_v23 = vld [vmem:[%s1857_s3 + $0x48] sm:$0xff]  ;;  %v54_v24 = vld [vmem:[%s1856_s2] sm:$0xff]  ;;  %v72_v26 = vld [vmem:[%s1856_s2 + $0x90] sm:$0xff]  ;;  %v1613_v7 = vshrl.u32 %v73_v6, 7 }
  0x19   :  { %150 = vmatprep.subr.mxu0 %v1340_v1  ;;  %1105 = vmatpush3.msra.mxu1 %v299_v17  ;;  %v295_v25 = vld [vmem:[%s1857_s3 + $0x40] sm:$0xff]  ;;  %v294_v27 = vld [vmem:[%s1857_s3 + $0x38] sm:$0xff]  ;;  %v71_v28 = vld [vmem:[%s1856_s2 + $0x88] sm:$0xff] }
  0x1a   :  { %151 = vmatpush1.msra.mxu0 %v57_v18  ;;  %1106 = vmatprep.subr.mxu1 %v298_v19  ;;  %v293_v29 = vld [vmem:[%s1857_s3 + $0x30] sm:$0xff]  ;;  %v70_v30 = vld [vmem:[%s1856_s2 + $0x80] sm:$0xff]  ;;  %v292_v31 = vld [vmem:[%s1857_s3 + $0x28] sm:$0xff]  ;;  %v75_v8 = vsub.s32 0, %v1613_v7 }
  0x1b   :  { %152 = vmatprep.subr.mxu0 %v1340_v1  ;;  %1107 = vmatpush3.msra.mxu1 %v298_v19  ;;  %v22_v32 = vld [vmem:[%s1854_s0] sm:$0xff]  ;;  %v25_v33 = vld [vmem:[%s1854_s0 + $0x18] sm:$0xff]  ;;  %v24_v35 = vld [vmem:[%s1854_s0 + $0x10] sm:$0xff] }
  0x1c   :  { %153 = vmatpush1.msra.mxu0 %v56_v20  ;;  %1108 = vmatprep.subr.mxu1 %v297_v21  ;;  %v291_v34 = vld [vmem:[%s1857_s3 + $0x20] sm:$0xff]  ;;  %v27_v36 = vld [vmem:[%s1854_s0 + $0x28] sm:$0xff]  ;;  %v29_v38 = vld [vmem:[%s1854_s0 + $0x38] sm:$0xff] }
  0x1d   :  { %154 = vmatprep.subr.mxu0 %v1340_v1  ;;  %1109 = vmatpush3.msra.mxu1 %v297_v21  ;;  %v26_v37 = vld [vmem:[%s1854_s0 + $0x20] sm:$0xff]  ;;  %v28_v39 = vld [vmem:[%s1854_s0 + $0x30] sm:$0xff]  ;;  %v31_v40 = vld [vmem:[%s1854_s0 + $0x48] sm:$0xff] }
  0x1e   :  { %155 = vmatpush1.msra.mxu0 %v55_v22  ;;  %1110 = vmatprep.subr.mxu1 %v296_v23  ;;  %v30_v41 = vld [vmem:[%s1854_s0 + $0x40] sm:$0xff]  ;;  %v33_v42 = vld [vmem:[%s1854_s0 + $0x58] sm:$0xff]  ;;  %v32_v43 = vld [vmem:[%s1854_s0 + $0x50] sm:$0xff] }
  0x1f   :  { %156 = vmatprep.subr.mxu0 %v1340_v1  ;;  %1111 = vmatpush3.msra.mxu1 %v296_v23  ;;  %v35_v44 = vld [vmem:[%s1854_s0 + $0x68] sm:$0xff]  ;;  %v34_v45 = vld [vmem:[%s1854_s0 + $0x60] sm:$0xff]  ;;  %v37_v46 = vld [vmem:[%s1854_s0 + $0x78] sm:$0xff] }
  0x20   :  { %157 = vmatpush1.msra.mxu0 %v54_v24  ;;  %1112 = vmatprep.subr.mxu1 %v295_v25  ;;  %v36_v47 = vld [vmem:[%s1854_s0 + $0x70] sm:$0xff]  ;;  %v39_v48 = vld [vmem:[%s1854_s0 + $0x88] sm:$0xff]  ;;  %v38_v49 = vld [vmem:[%s1854_s0 + $0x80] sm:$0xff] }
  0x21   :  { %184 = vmatprep.subr.mxu0 %v1340_v1  ;;  %1113 = vmatpush3.msra.mxu1 %v295_v25  ;;  %v41_v50 = vld [vmem:[%s1854_s0 + $0x98] sm:$0xff]  ;;  %v40_v51 = vld [vmem:[%s1854_s0 + $0x90] sm:$0xff]  ;;  %v43_v52 = vld [vmem:[%s1854_s0 + $0xa8] sm:$0xff] }
  0x22   :  { %185 = vmatpush2.msra.mxu0 %v72_v26  ;;  %1114 = vmatprep.subr.mxu1 %v294_v27  ;;  %v42_v53 = vld [vmem:[%s1854_s0 + $0xa0] sm:$0xff]  ;;  %v45_v54 = vld [vmem:[%s1854_s0 + $0xb8] sm:$0xff]  ;;  %v44_v55 = vld [vmem:[%s1854_s0 + $0xb0] sm:$0xff] }
  0x23   :  { %186 = vmatprep.subr.mxu0 %v1340_v1  ;;  %1115 = vmatpush3.msra.mxu1 %v294_v27  ;;  %v47_v56 = vld [vmem:[%s1854_s0 + $0xc8] sm:$0xff]  ;;  %v46_v57 = vld [vmem:[%s1854_s0 + $0xc0] sm:$0xff]  ;;  %v49_v58 = vld [vmem:[%s1854_s0 + $0xd8] sm:$0xff] }
  0x24   :  { %187 = vmatpush2.msra.mxu0 %v71_v28  ;;  %1116 = vmatprep.subr.mxu1 %v293_v29  ;;  %v48_v59 = vld [vmem:[%s1854_s0 + $0xd0] sm:$0xff]  ;;  %v51_v60 = vld [vmem:[%s1854_s0 + $0xe8] sm:$0xff]  ;;  %v50_v61 = vld [vmem:[%s1854_s0 + $0xe0] sm:$0xff] }
  0x25   :  { %188 = vmatprep.subr.mxu0 %v1340_v1  ;;  %1117 = vmatpush3.msra.mxu1 %v293_v29  ;;  %v53_v62 = vld [vmem:[%s1854_s0 + $0xf8] sm:$0xff]  ;;  %v52_v63 = vld [vmem:[%s1854_s0 + $0xf0] sm:$0xff]  ;;  %v288_v3 = vld [vmem:[%s1857_s3 + $0x8] sm:$0xff] }
  0x26   :  { %189 = vmatpush2.msra.mxu0 %v70_v30  ;;  %1118 = vmatprep.subr.mxu1 %v292_v31  ;;  %v290_v0 = vld [vmem:[%s1857_s3 + $0x18] sm:$0xff]  ;;  %v289_v2 = vld [vmem:[%s1857_s3 + $0x10] sm:$0xff]  ;;  %v287_v4 = vld [vmem:[%s1857_s3] sm:$0xff] }
  0x27   :  { %191 = vmatmul.mubr.f32.vlgmr.msra.gmra.mxu0 %v22_v32  ;;  %1119 = vmatpush3.msra.mxu1 %v292_v31  ;;  %v950_v5 = vld [vmem:[%s1857_s3 + $0xf8] sm:$0xff]  ;;  %v1619_v9 = vld [vmem:[%s1858_s4] sm:$0x1f]  ;;  %v949_v20 = vld [vmem:[%s1857_s3 + $0xf0] sm:$0xff] }
  0x28   :  { %920 = vmatprep.mubr.msk.f32.mxu0 %vm77_vm0, %v25_v33  ;;  %1120 = vmatprep.subr.mxu1 %v291_v34  ;;  %v1622_v10 = vrot.slane %v1619_v9, %v75_v8  ;;  %v948_v23 = vld [vmem:[%s1857_s3 + $0xe8] sm:$0xff]  ;;  %v947_v26 = vld [vmem:[%s1857_s3 + $0xe0] sm:$0xff]  ;;  %v946_v29 = vld [vmem:[%s1857_s3 + $0xd8] sm:$0xff] }
  0x29   :  { %1121 = vmatpush3.msra.mxu1 %v291_v34  ;;  %1245 = vmatprep.subr.mxu0 %v1340_v1  ;;  %v945_v32 = vld [vmem:[%s1857_s3 + $0xd0] sm:$0xff] }
  0x2a   :  { %1122 = vmatprep.subr.mxu1 %v290_v0 }
  0x2b   :  { %196 = vmatmul.mubr.f32.gmra.mxu0 %v24_v35  ;;  %1123 = vmatpush3.msra.mxu1 %v290_v0  ;;  %v944_v35 = vld [vmem:[%s1857_s3 + $0xc8] sm:$0xff] }
  0x2c   :  { %921 = vmatprep.mubr.msk.f32.mxu0 %vm77_vm0, %v27_v36  ;;  %1124 = vmatprep.subr.mxu1 %v289_v2 }
  0x2d   :  { %1125 = vmatpush3.msra.mxu1 %v289_v2 }
  0x2e   :  { %1126 = vmatprep.subr.mxu1 %v288_v3 }
  0x2f   :  { %201 = vmatmul.mubr.f32.gmra.mxu0 %v26_v37  ;;  %1127 = vmatpush3.msra.mxu1 %v288_v3 }
  0x30   :  { %922 = vmatprep.mubr.msk.f32.mxu0 %vm77_vm0, %v29_v38  ;;  %1128 = vmatprep.subr.mxu1 %v287_v4  ;;  %v943_v38 = vld [vmem:[%s1857_s3 + $0xc0] sm:$0xff] }
  0x31   :  { %1129 = vmatpush3.msra.mxu1 %v287_v4 }
  0x32   :  { %1154 = vmatprep.subr.mxu1 %v950_v5 }
  0x33   :  { %206 = vmatmul.mubr.f32.gmra.mxu0 %v28_v39 }
  0x34   :  { %923 = vmatprep.mubr.msk.f32.mxu0 %vm77_vm0, %v31_v40 }
  0x37   :  { %211 = vmatmul.mubr.f32.gmra.mxu0 %v30_v41  ;;  %v942_v41 = vld [vmem:[%s1857_s3 + $0xb8] sm:$0xff] }
  0x38   :  { %924 = vmatprep.mubr.msk.f32.mxu0 %vm77_vm0, %v33_v42 }
  0x3b   :  { %216 = vmatmul.mubr.f32.gmra.mxu0 %v32_v43 }
  0x3c   :  { %925 = vmatprep.mubr.msk.f32.mxu0 %vm77_vm0, %v35_v44  ;;  %v941_v44 = vld [vmem:[%s1857_s3 + $0xb0] sm:$0xff] }
  0x3f   :  { %221 = vmatmul.mubr.f32.gmra.mxu0 %v34_v45 }
  0x40   :  { %926 = vmatprep.mubr.msk.f32.mxu0 %vm77_vm0, %v37_v46 }
  0x43   :  { %226 = vmatmul.mubr.f32.gmra.mxu0 %v36_v47  ;;  %v940_v47 = vld [vmem:[%s1857_s3 + $0xa8] sm:$0xff] }
  0x44   :  { %927 = vmatprep.mubr.msk.f32.mxu0 %vm77_vm0, %v39_v48 }
  0x47   :  { %231 = vmatmul.mubr.f32.gmra.mxu0 %v38_v49 }
  0x48   :  { %928 = vmatprep.mubr.msk.f32.mxu0 %vm77_vm0, %v41_v50  ;;  %v939_v50 = vld [vmem:[%s1857_s3 + $0xa0] sm:$0xff] }
  0x4b   :  { %236 = vmatmul.mubr.f32.gmra.mxu0 %v40_v51 }
  0x4c   :  { %929 = vmatprep.mubr.msk.f32.mxu0 %vm77_vm0, %v43_v52 }
  0x4f   :  { %241 = vmatmul.mubr.f32.gmra.mxu0 %v42_v53 }
  0x50   :  { %930 = vmatprep.mubr.msk.f32.mxu0 %vm77_vm0, %v45_v54 }
  0x53   :  { %246 = vmatmul.mubr.f32.gmra.mxu0 %v44_v55 }
  0x54   :  { %931 = vmatprep.mubr.msk.f32.mxu0 %vm77_vm0, %v47_v56 }
  0x57   :  { %251 = vmatmul.mubr.f32.gmra.mxu0 %v46_v57 }
  0x58   :  { %932 = vmatprep.mubr.msk.f32.mxu0 %vm77_vm0, %v49_v58 }
  0x5b   :  { %256 = vmatmul.mubr.f32.gmra.mxu0 %v48_v59 }
  0x5c   :  { %933 = vmatprep.mubr.msk.f32.mxu0 %vm77_vm0, %v51_v60 }
  0x5f   :  { %261 = vmatmul.mubr.f32.gmra.mxu0 %v50_v61 }
  0x60   :  { %934 = vmatprep.mubr.msk.f32.mxu0 %vm77_vm0, %v53_v62 }
  0x63   :  { %266 = vmatmul.mubr.f32.gmra.mxu0 %v52_v63 }
  0x64   :  { %1277 = vmatprep.mubr.msk.f32.mxu0 %vm1341_vm1, %v1340_v1 }
  0xe7   :  { %v192_v11 = vpop.f32.mrf.mxu0 }
  0xe8   :  { %v193_v12 = vadd.f32 %v192_v11, %v1622_v10 }
  0xe9   :  { %v194_v13 = vpop.f32.mrf.mxu0 }
  0xea   :  { %v271_v14 = vmax.f32 %v193_v12, 0.0 }
  0xeb   :  { %v197_v15 = vpop.f32.mrf.mxu0 }
  0xec   :  { %v198_v16 = vadd.f32 %v197_v15, %v1622_v10  ;;  %1130 = vmatprep.mubr.f32.mxu1 %v271_v14 }
  0xed   :  { %v199_v17 = vpop.f32.mrf.mxu0 }
  0xee   :  { %v272_v18 = vmax.f32 %v198_v16, 0.0 }
  0xef   :  { %v202_v19 = vpop.f32.mrf.mxu0 }
  0xf0   :  { %v203_v21 = vadd.f32 %v202_v19, %v1622_v10  ;;  %1131 = vmatmul.mubr.f32.vlgmr.msra.gmra.mxu1 %v272_v18 }
  0xf1   :  { %v204_v22 = vpop.f32.mrf.mxu0  ;;  %1155 = vmatpush3.msra.mxu1 %v950_v5 }
  0xf2   :  { %v273_v24 = vmax.f32 %v203_v21, 0.0  ;;  %1156 = vmatprep.subr.mxu1 %v949_v20 }
  0xf3   :  { %v207_v25 = vpop.f32.mrf.mxu0  ;;  %1157 = vmatpush3.msra.mxu1 %v949_v20 }
  0xf4   :  { %v208_v27 = vadd.f32 %v207_v25, %v1622_v10  ;;  %1133 = vmatprep.mubr.f32.mxu1 %v273_v24  ;;  %1158 = vmatprep.subr.mxu1 %v948_v23 }
  0xf5   :  { %v209_v28 = vpop.f32.mrf.mxu0  ;;  %1159 = vmatpush3.msra.mxu1 %v948_v23 }
  0xf6   :  { %v274_v30 = vmax.f32 %v208_v27, 0.0  ;;  %1160 = vmatprep.subr.mxu1 %v947_v26  ;;  %v937_v27 = vld [vmem:[%s1857_s3 + $0x90] sm:$0xff]  ;;  %v935_v28 = vld [vmem:[%s1857_s3 + $0x80] sm:$0xff] }
  0xf7   :  { %v212_v31 = vpop.f32.mrf.mxu0  ;;  %1161 = vmatpush3.msra.mxu1 %v947_v26  ;;  %v938_v26 = vld [vmem:[%s1857_s3 + $0x98] sm:$0xff] }
  0xf8   :  { %v213_v33 = vadd.f32 %v212_v31, %v1622_v10  ;;  %1134 = vmatmul.mubr.f32.gmra.mxu1 %v274_v30  ;;  %1162 = vmatprep.subr.mxu1 %v946_v29 }
  0xf9   :  { %v214_v34 = vpop.f32.mrf.mxu0  ;;  %1163 = vmatpush3.msra.mxu1 %v946_v29  ;;  %v305_v29 = vsub.s32 1, %v1613_v7 }
  0xfa   :  { %v275_v36 = vmax.f32 %v213_v33, 0.0  ;;  %1164 = vmatprep.subr.mxu1 %v945_v32 }
  0xfb   :  { %v217_v37 = vpop.f32.mrf.mxu0  ;;  %1165 = vmatpush3.msra.mxu1 %v945_v32  ;;  %v306_v30 = vrot.slane %v1619_v9, %v305_v29  ;;  %v955_v29 = vld [vmem:[%s1857_s3 + $0x120] sm:$0xff] }
  0xfc   :  { %v218_v39 = vadd.f32 %v217_v37, %v1622_v10  ;;  %1136 = vmatprep.mubr.f32.mxu1 %v275_v36  ;;  %1166 = vmatprep.subr.mxu1 %v944_v35 }
  0xfd   :  { %v219_v40 = vpop.f32.mrf.mxu0  ;;  %1167 = vmatpush3.msra.mxu1 %v944_v35 }
  0xfe   :  { %v276_v42 = vmax.f32 %v218_v39, 0.0  ;;  %1168 = vmatprep.subr.mxu1 %v943_v38 }
  0xff   :  { %v222_v43 = vpop.f32.mrf.mxu0  ;;  %1169 = vmatpush3.msra.mxu1 %v943_v38 }
 0x100   :  { %v223_v45 = vadd.f32 %v222_v43, %v1622_v10  ;;  %1137 = vmatmul.mubr.f32.gmra.mxu1 %v276_v42  ;;  %1170 = vmatprep.subr.mxu1 %v942_v41 }
 0x101   :  { %v224_v46 = vpop.f32.mrf.mxu0  ;;  %1171 = vmatpush3.msra.mxu1 %v942_v41 }
 0x102   :  { %v277_v48 = vmax.f32 %v223_v45, 0.0  ;;  %1172 = vmatprep.subr.mxu1 %v941_v44 }
 0x103   :  { %v227_v49 = vpop.f32.mrf.mxu0  ;;  %1173 = vmatpush3.msra.mxu1 %v941_v44 }
 0x104   :  { %v228_v51 = vadd.f32 %v227_v49, %v1622_v10  ;;  %1139 = vmatprep.mubr.f32.mxu1 %v277_v48  ;;  %1174 = vmatprep.subr.mxu1 %v940_v47 }
 0x105   :  { %v229_v52 = vpop.f32.mrf.mxu0  ;;  %1175 = vmatpush3.msra.mxu1 %v940_v47 }
 0x106   :  { %v278_v53 = vmax.f32 %v228_v51, 0.0  ;;  %1176 = vmatprep.subr.mxu1 %v939_v50 }
 0x107   :  { %v232_v54 = vpop.f32.mrf.mxu0  ;;  %1177 = vmatpush3.msra.mxu1 %v939_v50 }
 0x108   :  { %v233_v55 = vadd.f32 %v232_v54, %v1622_v10  ;;  %1140 = vmatmul.mubr.f32.gmra.mxu1 %v278_v53  ;;  %1178 = vmatprep.subr.mxu1 %v938_v26 }
 0x109   :  { %v234_v56 = vpop.f32.mrf.mxu0  ;;  %1179 = vmatpush3.msra.mxu1 %v938_v26  ;;  %v959_v26 = vld [vmem:[%s1857_s3 + $0x140] sm:$0xff] }
 0x10a   :  { %v279_v57 = vmax.f32 %v233_v55, 0.0  ;;  %1180 = vmatprep.subr.mxu1 %v937_v27 }
 0x10b   :  { %v237_v58 = vpop.f32.mrf.mxu0  ;;  %1181 = vmatpush3.msra.mxu1 %v937_v27  ;;  %v958_v27 = vld [vmem:[%s1857_s3 + $0x138] sm:$0xff] }
 0x10c   :  { %v238_v59 = vadd.f32 %v237_v58, %v1622_v10  ;;  %1142 = vmatprep.mubr.f32.mxu1 %v279_v57 }
 0x10d   :  { %v239_v60 = vpop.f32.mrf.mxu0 }
 0x10e   :  { %v280_v61 = vmax.f32 %v238_v59, 0.0 }
 0x10f   :  { %v242_v62 = vpop.f32.mrf.mxu0 }
 0x110   :  { %v243_v63 = vadd.f32 %v242_v62, %v1622_v10  ;;  %1143 = vmatmul.mubr.f32.gmra.mxu1 %v280_v61 }
 0x111   :  { %v244_v0 = vpop.f32.mrf.mxu0 }
 0x112   :  { %v281_v2 = vmax.f32 %v243_v63, 0.0 }
 0x113   :  { %v247_v3 = vpop.f32.mrf.mxu0 }
 0x114   :  { %v248_v4 = vadd.f32 %v247_v3, %v1622_v10  ;;  %1145 = vmatprep.mubr.f32.mxu1 %v281_v2 }
 0x115   :  { %v249_v5 = vpop.f32.mrf.mxu0 }
 0x116   :  { %v282_v6 = vmax.f32 %v248_v4, 0.0 }
 0x117   :  { %v252_v8 = vpop.f32.mrf.mxu0 }
 0x118   :  { %v253_v11 = vadd.f32 %v252_v8, %v1622_v10  ;;  %1146 = vmatmul.mubr.f32.gmra.mxu1 %v282_v6 }
 0x119   :  { %v254_v12 = vpop.f32.mrf.mxu0 }
 0x11a   :  { %v283_v13 = vmax.f32 %v253_v11, 0.0 }
 0x11b   :  { %v257_v14 = vpop.f32.mrf.mxu0 }
 0x11c   :  { %v258_v15 = vadd.f32 %v257_v14, %v1622_v10  ;;  %1148 = vmatprep.mubr.f32.mxu1 %v283_v13 }
 0x11d   :  { %v259_v16 = vpop.f32.mrf.mxu0 }
 0x11e   :  { %v284_v17 = vmax.f32 %v258_v15, 0.0 }
 0x11f   :  { %v262_v18 = vpop.f32.mrf.mxu0 }
 0x120   :  { %v263_v19 = vadd.f32 %v262_v18, %v1622_v10  ;;  %1149 = vmatmul.mubr.f32.gmra.mxu1 %v284_v17 }
 0x121   :  { %v264_v20 = vpop.f32.mrf.mxu0 }
 0x122   :  { %v285_v21 = vmax.f32 %v263_v19, 0.0  ;;  %v966_v19 = vld [vmem:[%s1857_s3 + $0x178] sm:$0xff]  ;;  %v965_v20 = vld [vmem:[%s1857_s3 + $0x170] sm:$0xff] }
 0x123   :  { %v267_v22 = vpop.f32.mrf.mxu0  ;;  %1246 = vmatpush3.msra.mxu0 %v966_v19 }
 0x124   :  { %v268_v23 = vadd.f32 %v267_v22, %v1622_v10  ;;  %1151 = vmatprep.mubr.f32.mxu1 %v285_v21  ;;  %v936_v10 = vld [vmem:[%s1857_s3 + $0x88] sm:$0xff]  ;;  %1247 = vmatprep.subr.mxu0 %v1340_v1  ;;  %v963_v22 = vld [vmem:[%s1857_s3 + $0x160] sm:$0xff] }
 0x125   :  { %v269_v24 = vpop.f32.mrf.mxu0  ;;  %1182 = vmatprep.subr.mxu1 %v936_v10  ;;  %v964_v21 = vld [vmem:[%s1857_s3 + $0x168] sm:$0xff]  ;;  %1248 = vmatpush3.msra.mxu0 %v965_v20 }
 0x126   :  { %v286_v25 = vmax.f32 %v268_v23, 0.0  ;;  %1183 = vmatpush3.msra.mxu1 %v936_v10  ;;  %1249 = vmatprep.subr.mxu0 %v1340_v1  ;;  %v962_v23 = vld [vmem:[%s1857_s3 + $0x158] sm:$0xff]  ;;  %v961_v24 = vld [vmem:[%s1857_s3 + $0x150] sm:$0xff] }
 0x127   :  { %1184 = vmatprep.subr.mxu1 %v935_v28  ;;  %1250 = vmatpush3.msra.mxu0 %v964_v21  ;;  %v957_v10 = vld [vmem:[%s1857_s3 + $0x130] sm:$0xff] }
 0x128   :  { %1152 = vmatmul.mubr.f32.gmra.mxu1 %v286_v25  ;;  %1251 = vmatprep.subr.mxu0 %v1340_v1  ;;  %v960_v25 = vld [vmem:[%s1857_s3 + $0x148] sm:$0xff] }
 0x129   :  { %1185 = vmatpush3.msra.mxu1 %v935_v28  ;;  %1252 = vmatpush3.msra.mxu0 %v963_v22  ;;  %v956_v28 = vld [vmem:[%s1857_s3 + $0x128] sm:$0xff] }
 0x12a   :  { %1210 = vmatprep.subr.mxu1 %v1340_v1  ;;  %1253 = vmatprep.subr.mxu0 %v1340_v1 }
 0x12b   :  { %1254 = vmatpush3.msra.mxu0 %v962_v23 }
 0x12c   :  { %1255 = vmatprep.subr.mxu0 %v1340_v1 }
 0x12d   :  { %1256 = vmatpush3.msra.mxu0 %v961_v24  ;;  %v650_v24 = vld [vmem:[%s1855_s1] sm:$0x3]  ;;  %s911_s1 = sshll.u32 %s1342_s11, 4  ;;  %s912_s1 = int_to_ptr.vmem [resolvable:$true] %s911_s1 }
 0x12e   :  { %1257 = vmatprep.subr.mxu0 %v1340_v1  ;;  %p1323_p1 = scmp.lt.s32.totalorder %s912_s1, %s912_s1 }
 0x12f   :  { %1258 = vmatpush3.msra.mxu0 %v960_v25  ;;  %v982_v25 = vld [vmem:[%s1857_s3 + $0x1f8] sm:$0xff] }
 0x130   :  { %1259 = vmatprep.subr.mxu0 %v1340_v1 }
 0x131   :  { %1260 = vmatpush3.msra.mxu0 %v959_v26  ;;  %v981_v26 = vld [vmem:[%s1857_s3 + $0x1f0] sm:$0xff] }
 0x132   :  { %1261 = vmatprep.subr.mxu0 %v1340_v1 }
 0x133   :  { %1262 = vmatpush3.msra.mxu0 %v958_v27  ;;  %v980_v27 = vld [vmem:[%s1857_s3 + $0x1e8] sm:$0xff] }
 0x134   :  { %1263 = vmatprep.subr.mxu0 %v1340_v1 }
 0x135   :  { %1264 = vmatpush3.msra.mxu0 %v957_v10  ;;  %v979_v10 = vld [vmem:[%s1857_s3 + $0x1e0] sm:$0xff] }
 0x136   :  { %1265 = vmatprep.subr.mxu0 %v1340_v1 }
 0x137   :  { %1266 = vmatpush3.msra.mxu0 %v956_v28  ;;  %v978_v28 = vld [vmem:[%s1857_s3 + $0x1d8] sm:$0xff] }
 0x138   :  { %1267 = vmatprep.subr.mxu0 %v1340_v1 }
 0x139   :  { %1268 = vmatpush3.msra.mxu0 %v955_v29  ;;  %v977_v29 = vld [vmem:[%s1857_s3 + $0x1d0] sm:$0xff] }
 0x13a   :  { %1269 = vmatprep.subr.mxu0 %v1340_v1 }
 0x1b0   :  { %v1132_v31 = vpop.f32.mrf.mxu1 }
 0x1b1   :  { %v379_v32 = vadd.f32 %v1132_v31, %v306_v30  ;;  %v953_v31 = vld [vmem:[%s1857_s3 + $0x110] sm:$0xff] }
 0x1b2   :  { %v373_v33 = vpop.f32.mrf.mxu1 }
 0x1b3   :  { %v374_v34 = vadd.f32 %v373_v33, %v306_v30  ;;  %v453_v36 = vmax.f32 %v379_v32, 0.0  ;;  %v952_v32 = vld [vmem:[%s1857_s3 + $0x108] sm:$0xff]  ;;  %v951_v33 = vld [vmem:[%s1857_s3 + $0x100] sm:$0xff] }
 0x1b5   :  { %v452_v35 = vmax.f32 %v374_v34, 0.0 }
 0x1b7   :  { %1186 = vmatprep.mubr.f32.mxu1 %v452_v35 }
 0x1b8   :  { %v1135_v37 = vpop.f32.mrf.mxu1  ;;  %1187 = vmatmul.mubr.f32.vlgmr.msra.gmra.mxu1 %v453_v36 }
 0x1b9   :  { %v389_v38 = vadd.f32 %v1135_v37, %v306_v30 }
 0x1ba   :  { %v383_v39 = vpop.f32.mrf.mxu1 }
 0x1bb   :  { %v384_v40 = vadd.f32 %v383_v39, %v306_v30  ;;  %v455_v42 = vmax.f32 %v389_v38, 0.0 }
 0x1bd   :  { %v454_v41 = vmax.f32 %v384_v40, 0.0 }
 0x1bf   :  { %1189 = vmatprep.mubr.f32.mxu1 %v454_v41 }
 0x1c0   :  { %v1138_v43 = vpop.f32.mrf.mxu1  ;;  %1190 = vmatmul.mubr.f32.gmra.mxu1 %v455_v42 }
 0x1c1   :  { %v399_v44 = vadd.f32 %v1138_v43, %v306_v30 }
 0x1c2   :  { %v393_v45 = vpop.f32.mrf.mxu1 }
 0x1c3   :  { %v394_v46 = vadd.f32 %v393_v45, %v306_v30  ;;  %v457_v48 = vmax.f32 %v399_v44, 0.0 }
 0x1c5   :  { %v456_v47 = vmax.f32 %v394_v46, 0.0 }
 0x1c7   :  { %1192 = vmatprep.mubr.f32.mxu1 %v456_v47  ;;  %v487_v47 = vsub.s32 2, %v1613_v7 }
 0x1c8   :  { %v1141_v49 = vpop.f32.mrf.mxu1  ;;  %1193 = vmatmul.mubr.f32.gmra.mxu1 %v457_v48 }
 0x1c9   :  { %v409_v50 = vadd.f32 %v1141_v49, %v306_v30  ;;  %v488_v49 = vrot.slane %v1619_v9, %v487_v47 }
 0x1ca   :  { %v403_v51 = vpop.f32.mrf.mxu1 }
 0x1cb   :  { %v404_v52 = vadd.f32 %v403_v51, %v306_v30  ;;  %v459_v54 = vmax.f32 %v409_v50, 0.0 }
 0x1cd   :  { %v458_v53 = vmax.f32 %v404_v52, 0.0 }
 0x1cf   :  { %1195 = vmatprep.mubr.f32.mxu1 %v458_v53 }
 0x1d0   :  { %v1144_v55 = vpop.f32.mrf.mxu1  ;;  %1196 = vmatmul.mubr.f32.gmra.mxu1 %v459_v54 }
 0x1d1   :  { %v419_v56 = vadd.f32 %v1144_v55, %v306_v30 }
 0x1d2   :  { %v413_v57 = vpop.f32.mrf.mxu1 }
 0x1d3   :  { %v414_v58 = vadd.f32 %v413_v57, %v306_v30  ;;  %v461_v60 = vmax.f32 %v419_v56, 0.0 }
 0x1d5   :  { %v460_v59 = vmax.f32 %v414_v58, 0.0 }
 0x1d7   :  { %1198 = vmatprep.mubr.f32.mxu1 %v460_v59 }
 0x1d8   :  { %v1147_v61 = vpop.f32.mrf.mxu1  ;;  %1199 = vmatmul.mubr.f32.gmra.mxu1 %v461_v60 }
 0x1d9   :  { %v429_v62 = vadd.f32 %v1147_v61, %v306_v30 }
 0x1da   :  { %v423_v63 = vpop.f32.mrf.mxu1 }
 0x1db   :  { %v424_v0 = vadd.f32 %v423_v63, %v306_v30  ;;  %v463_v3 = vmax.f32 %v429_v62, 0.0 }
 0x1dd   :  { %v462_v2 = vmax.f32 %v424_v0, 0.0 }
 0x1df   :  { %1201 = vmatprep.mubr.f32.mxu1 %v462_v2 }
 0x1e0   :  { %v1150_v4 = vpop.f32.mrf.mxu1  ;;  %1202 = vmatmul.mubr.f32.gmra.mxu1 %v463_v3 }
 0x1e1   :  { %v439_v5 = vadd.f32 %v1150_v4, %v306_v30 }
 0x1e2   :  { %v433_v6 = vpop.f32.mrf.mxu1 }
 0x1e3   :  { %v434_v8 = vadd.f32 %v433_v6, %v306_v30  ;;  %v465_v12 = vmax.f32 %v439_v5, 0.0 }
 0x1e5   :  { %v464_v11 = vmax.f32 %v434_v8, 0.0 }
 0x1e7   :  { %1204 = vmatprep.mubr.f32.mxu1 %v464_v11 }
 0x1e8   :  { %v1153_v13 = vpop.f32.mrf.mxu1  ;;  %1205 = vmatmul.mubr.f32.gmra.mxu1 %v465_v12 }
 0x1e9   :  { %v449_v14 = vadd.f32 %v1153_v13, %v306_v30 }
 0x1ea   :  { %v443_v15 = vpop.f32.mrf.mxu1 }
 0x1eb   :  { %v444_v16 = vadd.f32 %v443_v15, %v306_v30  ;;  %v467_v18 = vmax.f32 %v449_v14, 0.0  ;;  %v954_v30 = vld [vmem:[%s1857_s3 + $0x118] sm:$0xff] }
 0x1ec   :  { %1270 = vmatpush3.msra.mxu0 %v954_v30  ;;  %v976_v30 = vld [vmem:[%s1857_s3 + $0x1c8] sm:$0xff] }
 0x1ed   :  { %v466_v17 = vmax.f32 %v444_v16, 0.0  ;;  %1271 = vmatprep.subr.mxu0 %v1340_v1 }
 0x1ee   :  { %1272 = vmatpush3.msra.mxu0 %v953_v31  ;;  %v975_v31 = vld [vmem:[%s1857_s3 + $0x1c0] sm:$0xff] }
 0x1ef   :  { %1207 = vmatprep.mubr.f32.mxu1 %v466_v17  ;;  %1273 = vmatprep.subr.mxu0 %v1340_v1 }
 0x1f0   :  { %1208 = vmatmul.mubr.f32.gmra.mxu1 %v467_v18  ;;  %1274 = vmatpush3.msra.mxu0 %v952_v32  ;;  %v974_v32 = vld [vmem:[%s1857_s3 + $0x1b8] sm:$0xff] }
 0x1f1   :  { %1242 = vmatprep.mubr.msk.f32.mxu1 %vm1341_vm1, %v1340_v1  ;;  %1275 = vmatprep.subr.mxu0 %v1340_v1 }
 0x1f2   :  { %1276 = vmatpush3.msra.mxu0 %v951_v33  ;;  %v973_v33 = vld [vmem:[%s1857_s3 + $0x1b0] sm:$0xff] }
 0x278   :  { %v1755_v34 = vpop.f32.mrf.mxu1 }
 0x279   :  { %v561_v18 = vadd.f32 %v1755_v34, %v488_v49  ;;  %v972_v34 = vld [vmem:[%s1857_s3 + $0x1a8] sm:$0xff] }
 0x27a   :  { %v1757_v35 = vpop.f32.mrf.mxu1 }
 0x27b   :  { %v556_v20 = vadd.f32 %v1757_v35, %v488_v49  ;;  %v635_v22 = vmax.f32 %v561_v18, 0.0  ;;  %v971_v35 = vld [vmem:[%s1857_s3 + $0x1a0] sm:$0xff] }
 0x27d   :  { %v634_v23 = vmax.f32 %v556_v20, 0.0 }
 0x280   :  { %v1191_v36 = vpop.f32.mrf.mxu1 }
 0x281   :  { %v571_v14 = vadd.f32 %v1191_v36, %v488_v49  ;;  %v970_v36 = vld [vmem:[%s1857_s3 + $0x198] sm:$0xff] }
 0x282   :  { %v565_v37 = vpop.f32.mrf.mxu1 }
 0x283   :  { %v566_v16 = vadd.f32 %v565_v37, %v488_v49  ;;  %v637_v19 = vmax.f32 %v571_v14, 0.0 }
 0x285   :  { %v636_v21 = vmax.f32 %v566_v16, 0.0 }
 0x288   :  { %v1194_v38 = vpop.f32.mrf.mxu1 }
 0x289   :  { %v581_v8 = vadd.f32 %v1194_v38, %v488_v49 }
 0x28a   :  { %v575_v39 = vpop.f32.mrf.mxu1 }
 0x28b   :  { %v576_v12 = vadd.f32 %v575_v39, %v488_v49  ;;  %v639_v15 = vmax.f32 %v581_v8, 0.0  ;;  %v969_v39 = vld [vmem:[%s1857_s3 + $0x190] sm:$0xff] }
 0x28d   :  { %v638_v17 = vmax.f32 %v576_v12, 0.0 }
 0x290   :  { %v1197_v40 = vpop.f32.mrf.mxu1 }
 0x291   :  { %v591_v3 = vadd.f32 %v1197_v40, %v488_v49  ;;  %v968_v40 = vld [vmem:[%s1857_s3 + $0x188] sm:$0xff] }
 0x292   :  { %v585_v41 = vpop.f32.mrf.mxu1 }
 0x293   :  { %v586_v5 = vadd.f32 %v585_v41, %v488_v49  ;;  %v641_v11 = vmax.f32 %v591_v3, 0.0  ;;  %v967_v41 = vld [vmem:[%s1857_s3 + $0x180] sm:$0xff]  ;;  %s1318_s3 = scalar_lea.vmem %s912_s1, 32 }
 0x294   :  { %p1319_p0 = scmp.ne.s32.totalorder %s912_s1, %s1318_s3  ;;  %p1324_p2 = scmp.lt.s32.totalorder %s1318_s3, %s1318_s3 }
 0x295   :  { %v640_v13 = vmax.f32 %v586_v5, 0.0 }
 0x296   :  { %p1325_p3 = por %p1324_p2, %p1323_p1 }
 0x298   :  { %v1200_v42 = vpop.f32.mrf.mxu1  ;;  %p1326_p4 = pnand %p1325_p3, %p1319_p0 }
 0x299   :  { %v601_v62 = vadd.f32 %v1200_v42, %v488_v49  ;;  %v740_v42 = vsub.s32 3, %v1613_v7 }
 0x29a   :  { %v595_v43 = vpop.f32.mrf.mxu1 }
 0x29b   :  { %v596_v0 = vadd.f32 %v595_v43, %v488_v49  ;;  %v643_v4 = vmax.f32 %v601_v62, 0.0  ;;  %v741_v43 = vrot.slane %v1619_v9, %v740_v42 }
 0x29d   :  { %v642_v6 = vmax.f32 %v596_v0, 0.0 }
 0x2a0   :  { %v1203_v44 = vpop.f32.mrf.mxu1 }
 0x2a1   :  { %v611_v58 = vadd.f32 %v1203_v44, %v488_v49 }
 0x2a2   :  { %v605_v45 = vpop.f32.mrf.mxu1 }
 0x2a3   :  { %v606_v60 = vadd.f32 %v605_v45, %v488_v49  ;;  %v645_v63 = vmax.f32 %v611_v58, 0.0 }
 0x2a5   :  { %v644_v2 = vmax.f32 %v606_v60, 0.0 }
 0x2a8   :  { %v1206_v46 = vpop.f32.mrf.mxu1 }
 0x2a9   :  { %v621_v53 = vadd.f32 %v1206_v46, %v488_v49 }
 0x2aa   :  { %v615_v48 = vpop.f32.mrf.mxu1 }
 0x2ab   :  { %v616_v56 = vadd.f32 %v615_v48, %v488_v49  ;;  %v647_v59 = vmax.f32 %v621_v53, 0.0  ;;  %v832_v48 = vsub.s32 4, %v1613_v7 }
 0x2ad   :  { %v646_v61 = vmax.f32 %v616_v56, 0.0 }
 0x2b0   :  { %v1209_v50 = vpop.f32.mrf.mxu1 }
 0x2b1   :  { %v631_v51 = vadd.f32 %v1209_v50, %v488_v49 }
 0x2b2   :  { %v625_v52 = vpop.f32.mrf.mxu1 }
 0x2b3   :  { %v649_v54 = vmax.f32 %v631_v51, 0.0  ;;  %v626_v55 = vadd.f32 %v625_v52, %v488_v49  ;;  %v833_v49 = vrot.slane %v1619_v9, %v832_v48 }
 0x2b5   :  { %v648_v57 = vmax.f32 %v626_v55, 0.0  ;;  %1211 = vmatpush3.msra.mxu1 %v649_v54 }
 0x2b6   :  { %1212 = vmatprep.subr.mxu1 %v1340_v1 }
 0x2b7   :  { %1213 = vmatpush3.msra.mxu1 %v648_v57 }
 0x2b8   :  { %1214 = vmatprep.subr.mxu1 %v1340_v1 }
 0x2b9   :  { %1215 = vmatpush3.msra.mxu1 %v647_v59 }
 0x2ba   :  { %1216 = vmatprep.subr.mxu1 %v1340_v1 }
 0x2bb   :  { %1217 = vmatpush3.msra.mxu1 %v646_v61 }
 0x2bc   :  { %1218 = vmatprep.subr.mxu1 %v1340_v1 }
 0x2bd   :  { %1219 = vmatpush3.msra.mxu1 %v645_v63 }
 0x2be   :  { %1220 = vmatprep.subr.mxu1 %v1340_v1 }
 0x2bf   :  { %1221 = vmatpush3.msra.mxu1 %v644_v2 }
 0x2c0   :  { %1222 = vmatprep.subr.mxu1 %v1340_v1 }
 0x2c1   :  { %1223 = vmatpush3.msra.mxu1 %v643_v4 }
 0x2c2   :  { %1224 = vmatprep.subr.mxu1 %v1340_v1 }
 0x2c3   :  { %1225 = vmatpush3.msra.mxu1 %v642_v6 }
 0x2c4   :  { %1226 = vmatprep.subr.mxu1 %v1340_v1 }
 0x2c5   :  { %1227 = vmatpush3.msra.mxu1 %v641_v11 }
 0x2c6   :  { %1228 = vmatprep.subr.mxu1 %v1340_v1 }
 0x2c7   :  { %1229 = vmatpush3.msra.mxu1 %v640_v13 }
 0x2c8   :  { %1230 = vmatprep.subr.mxu1 %v1340_v1 }
 0x2c9   :  { %1231 = vmatpush3.msra.mxu1 %v639_v15 }
 0x2ca   :  { %1232 = vmatprep.subr.mxu1 %v1340_v1 }
 0x2cb   :  { %1233 = vmatpush3.msra.mxu1 %v638_v17 }
 0x2cc   :  { %1234 = vmatprep.subr.mxu1 %v1340_v1 }
 0x2cd   :  { %1235 = vmatpush3.msra.mxu1 %v637_v19 }
 0x2ce   :  { %1236 = vmatprep.subr.mxu1 %v1340_v1 }
 0x2cf   :  { %1237 = vmatpush3.msra.mxu1 %v636_v21 }
 0x2d0   :  { %1238 = vmatprep.subr.mxu1 %v1340_v1 }
 0x2d1   :  { %1239 = vmatpush3.msra.mxu1 %v635_v22 }
 0x2d2   :  { %1240 = vmatprep.subr.mxu1 %v1340_v1 }
 0x2d3   :  { %1241 = vmatpush3.msra.mxu1 %v634_v23 }
 0x2d4   :  { %1243 = vmatmul.mubr.f32.vlgmr.msra.gmra.mxu1 %v650_v24  ;;  %1280 = vmatprep.subr.mxu1 %v1340_v1 }
 0x2d5   :  { %1312 = vmatprep.mubr.msk.f32.mxu1 %vm1341_vm1, %v1340_v1  ;;  %1281 = vmatpush3.msra.mxu1 %v982_v25 }
 0x2d6   :  { %1282 = vmatprep.subr.mxu1 %v1340_v1 }
 0x2d7   :  { %1283 = vmatpush3.msra.mxu1 %v981_v26 }
 0x2d8   :  { %1284 = vmatprep.subr.mxu1 %v1340_v1 }
 0x2d9   :  { %1285 = vmatpush3.msra.mxu1 %v980_v27 }
 0x2da   :  { %1286 = vmatprep.subr.mxu1 %v1340_v1 }
 0x2db   :  { %1287 = vmatpush3.msra.mxu1 %v979_v10 }
 0x2dc   :  { %1288 = vmatprep.subr.mxu1 %v1340_v1 }
 0x2dd   :  { %1289 = vmatpush3.msra.mxu1 %v978_v28 }
 0x2de   :  { %1290 = vmatprep.subr.mxu1 %v1340_v1 }
 0x2df   :  { %1291 = vmatpush3.msra.mxu1 %v977_v29 }
 0x2e0   :  { %1292 = vmatprep.subr.mxu1 %v1340_v1 }
 0x2e1   :  { %1293 = vmatpush3.msra.mxu1 %v976_v30 }
 0x2e2   :  { %1294 = vmatprep.subr.mxu1 %v1340_v1 }
 0x2e3   :  { %1295 = vmatpush3.msra.mxu1 %v975_v31 }
 0x2e4   :  { %1296 = vmatprep.subr.mxu1 %v1340_v1 }
 0x2e5   :  { %1297 = vmatpush3.msra.mxu1 %v974_v32 }
 0x2e6   :  { %1298 = vmatprep.subr.mxu1 %v1340_v1 }
 0x2e7   :  { %1299 = vmatpush3.msra.mxu1 %v973_v33 }
 0x2e8   :  { %1300 = vmatprep.subr.mxu1 %v1340_v1 }
 0x2e9   :  { %1301 = vmatpush3.msra.mxu1 %v972_v34 }
 0x2ea   :  { %1302 = vmatprep.subr.mxu1 %v1340_v1 }
 0x2eb   :  { %1303 = vmatpush3.msra.mxu1 %v971_v35 }
 0x2ec   :  { %1304 = vmatprep.subr.mxu1 %v1340_v1 }
 0x2ed   :  { %1305 = vmatpush3.msra.mxu1 %v970_v36 }
 0x2ee   :  { %1306 = vmatprep.subr.mxu1 %v1340_v1 }
 0x2ef   :  { %1307 = vmatpush3.msra.mxu1 %v969_v39 }
 0x2f0   :  { %1308 = vmatprep.subr.mxu1 %v1340_v1 }
 0x2f1   :  { %1309 = vmatpush3.msra.mxu1 %v968_v40 }
 0x2f2   :  { %1310 = vmatprep.subr.mxu1 %v1340_v1 }
 0x2f3   :  { %1311 = vmatpush3.msra.mxu1 %v967_v41 }
 0x394   :  { %v717_v37 = vpop.f32.mrf.mxu1 }
 0x395   :  { %1278 = vmatmul.mubr.f32.vlgmr.msra.gmra.mxu0 %v717_v37 }
 0x396   :  { %v1244_v38 = vpop.f32.mrf.mxu1 }
 0x455   :  { %v808_v44 = vpop.f32.mrf.mxu0 }
 0x456   :  { %v809_v45 = vadd.f32 %v808_v44, %v741_v43 }
 0x457   :  { %v1279_v46 = vpop.f32.mrf.mxu0 }
 0x458   :  { %v812_v47 = vmax.f32 %v809_v45, 0.0 }
 0x45a   :  { %1313 = vmatmul.mubr.f32.vlgmr.msra.gmra.mxu1 %v812_v47 }
 0x51a   :  { %v900_v1 = vpop.f32.mrf.mxu1 }
 0x51b   :  { %v901_v50 = vadd.f32 %v900_v1, %v833_v49 }
 0x51c   :  { %v1314_v51 = vpop.f32.mrf.mxu1 }
 0x51d   :  { %904 = vst [vmem:[#allocation2] sm:$0x3] %v901_v50 }
 0x51e   :  { %1329 = shalt.err (!%p1326_p4)
}
 0x51f   :  { %914 = dma.vmem_to_hbm [thread:$0]  %s912_s1, 32, %s1859_s5, [#allocation3]  }
 0x520   :  { %1338 = dma.done.wait [#allocation3], 32  }
 0x521   :  { %1339 = vsyncadd [#allocation3], 4294967264 }
 0x522   :  { %918 = vsyncpa [#allocation3], 1 }

</bundles_post_ra>
